<compile_context>
chip_gen: v7x
topology: tpu7x:2x2x1
jax: 0.10.0
libtpu: 0.0.40
codegen_flags: <defaults>
</compile_context>

<pallas_src>
import math

import jax
import jax.numpy as jnp
from jax.experimental import pallas as pl
from jax.experimental.pallas import tpu as pltpu

LOG_10_000 = 9.210340371976184


def timestep_emb_kernel(t_ref, tbl_ref, w1_ref, b1_ref, w2_ref, b2_ref, o_ref):
    """One row-tile: sinusoidal embedding + Linear -> SiLU -> Linear."""
    t = t_ref[...]                                # (TB, 1) f32
    tbl = tbl_ref[...]                            # (2, emb_dim) f32: [freq; phase]
    # cos(x) computed as sin(x + pi/2): single EUP transcendental, no select.
    angle = t * tbl[0:1, :] + tbl[1:2, :]         # (TB, emb_dim)
    sinusoidal = jnp.sin(angle)

    # MLP: Linear -> SiLU -> Linear.  bf16 MXU operands, f32 accumulation.
    h = jnp.dot(sinusoidal.astype(w1_ref.dtype), w1_ref[...],
                preferred_element_type=jnp.float32) + b1_ref[...]
    # SiLU via the exact identity sigmoid(h) = 0.5 * (1 + tanh(h / 2)):
    # one EUP op, no overflow path, no approximate reciprocal error.
    h = h * (0.5 * jnp.tanh(0.5 * h) + 0.5)
    out = jnp.dot(h.astype(w2_ref.dtype), w2_ref[...],
                  preferred_element_type=jnp.float32) + b2_ref[...]
    o_ref[...] = out.astype(o_ref.dtype)


def _round_up(x, m):
    return -(-x // m) * m


def _jax_forward(timesteps, w1, b1, w2, b2):
    """Pure-JAX path mirroring the PyTorch module (cos-first, then sin)."""
    emb_dim = w1.shape[0]
    half = emb_dim // 2
    t = timesteps.astype(jnp.float32)[:, None]
    freqs = jnp.exp(
        -LOG_10_000 * jnp.arange(half, dtype=jnp.float32) / half)[None, :]
    sinus = jnp.concatenate([jnp.cos(t * freqs), jnp.sin(t * freqs)], axis=1)
    h = sinus @ w1 + b1
    h = h * jax.nn.sigmoid(h)
    return h @ w2 + b2


def timestep_embeddings(timesteps, w1, b1, w2, b2, *, block_b=2048,
                        out_dtype=jnp.float32, mxu_dtype=jnp.bfloat16,
                        small_b=512, force_pallas=False):
    """timesteps: (B,); w1: (emb_dim, hid); b1: (hid,); w2: (hid, out); b2: (out,).

    Weights are stored pre-transposed as (in_features, out_features), i.e.
    torch's W.T, so the kernel computes y = x @ W + b.
    """
    B = timesteps.shape[0]
    emb_dim, hid = w1.shape
    out_dim = w2.shape[1]
    assert emb_dim % 2 == 0, "timestep_emb_dim must be even"
    half = emb_dim // 2

    # At tiny B the whole cost is kernel launch + the one-time weight DMA;
    # let XLA fuse the tiny MLP instead of paying a standalone pallas_call.
    if B < small_b and not force_pallas:
        return _jax_forward(timesteps, w1, b1, w2, b2).astype(out_dtype)

    # Hoisted constant table (XLA constant-folds it): row 0 = frequencies
    # duplicated for the cos/sin halves, row 1 = phase (pi/2 for the cos half,
    # 0 for the sin half) so the kernel does a single sin(t*freq + phase).
    k = jnp.arange(half, dtype=jnp.float32)
    freqs_half = jnp.exp(-LOG_10_000 * k / float(half))
    freqs = jnp.concatenate([freqs_half, freqs_half])
    phase = jnp.concatenate([jnp.full((half,), math.pi / 2, jnp.float32),
                             jnp.zeros((half,), jnp.float32)])
    tbl = jnp.stack([freqs, phase], axis=0)            # (2, emb_dim)

    # Row tile: multiple of 8 sublanes, capped at block_b, and capped at
    # ceil(B/2) so the grid has >=2 steps whenever possible (keeps both v7x
    # TensorCores busy under dimension_semantics=("parallel",)).
    tb = max(8, min(block_b, _round_up(-(-B // 2), 8)))
    B_pad = _round_up(B, tb)

    t2 = timesteps.astype(jnp.float32).reshape(B, 1)
    if B_pad != B:
        # Padded rows run a zero timestep through the MLP and are sliced off.
        t2 = jnp.pad(t2, ((0, B_pad - B), (0, 0)))

    w1c = w1.astype(mxu_dtype)
    w2c = w2.astype(mxu_dtype)

    grid = (B_pad // tb,)
    out = pl.pallas_call(
        timestep_emb_kernel,
        out_shape=jax.ShapeDtypeStruct((B_pad, out_dim), out_dtype),
        grid=grid,
        in_specs=[
            # Row-blocked timestep column (1 lane wide; lane-padded in VMEM).
            pl.BlockSpec((tb, 1), lambda i: (i, 0)),
            # Constant table + weights/biases: constant index_map -> fetched
            # once and resident in VMEM across grid steps.
            pl.BlockSpec((2, emb_dim), lambda i: (0, 0)),
            pl.BlockSpec((emb_dim, hid), lambda i: (0, 0)),
            pl.BlockSpec((1, hid), lambda i: (0, 0)),
            pl.BlockSpec((hid, out_dim), lambda i: (0, 0)),
            pl.BlockSpec((1, out_dim), lambda i: (0, 0)),
        ],
        out_specs=pl.BlockSpec((tb, out_dim), lambda i: (i, 0)),
        compiler_params=pltpu.CompilerParams(
            dimension_semantics=("parallel",)),
    )(t2, tbl, w1c, b1.reshape(1, hid), w2c, b2.reshape(1, out_dim))
    return out[:B]


if __name__ == "__main__":
    timestep_emb_dim = 32
    out_emb_dim = 128

    key = jax.random.PRNGKey(0)
    k_t, k_w1, k_b1, k_w2, k_b2, k_t2 = jax.random.split(key, 6)

    # Deterministic synthetic parameters (stored as (in, out), i.e. torch W.T).
    w1 = jax.random.normal(k_w1, (timestep_emb_dim, out_emb_dim), jnp.float32) * 0.05
    b1 = jax.random.normal(k_b1, (out_emb_dim,), jnp.float32) * 0.05
    w2 = jax.random.normal(k_w2, (out_emb_dim, out_emb_dim), jnp.float32) * 0.05
    b2 = jax.random.normal(k_b2, (out_emb_dim,), jnp.float32) * 0.05

    # Small demo batch, forced through the Pallas path to exercise the kernel.
    B = 8
    timesteps = jax.random.randint(k_t, (B,), 0, 1000).astype(jnp.float32)
    out = timestep_embeddings(timesteps, w1, b1, w2, b2, force_pallas=True)
    out = jax.block_until_ready(out)
    ref = _jax_forward(timesteps, w1, b1, w2, b2)
    assert out.shape == (B, out_emb_dim)
    # Tolerance accommodates bf16 MXU operands (f32 accumulation).
    assert jnp.allclose(out, ref, rtol=5e-3, atol=5e-3), "mismatch vs reference (B=8)"

    # Larger batch: exercises row tiling, padding and the >=2-step grid.
    B2 = 1037
    timesteps2 = jax.random.randint(k_t2, (B2,), 0, 1000).astype(jnp.float32)
    out2 = timestep_embeddings(timesteps2, w1, b1, w2, b2)
    out2 = jax.block_until_ready(out2)
    ref2 = _jax_forward(timesteps2, w1, b1, w2, b2)
    assert out2.shape == (B2, out_emb_dim)
    assert jnp.allclose(out2, ref2, rtol=5e-3, atol=5e-3), "mismatch vs reference (B=1037)"

    print("KERNEL_OK")
</pallas_src>

<mosaic_0001>
module attributes {stable_mosaic.version = 11 : i64} {
  func.func @timestep_emb_kernel(%arg0: i32, %arg1: memref<8x1xf32, #tpu.memory_space<vmem>>, %arg2: memref<2x32xf32, #tpu.memory_space<vmem>>, %arg3: memref<32x128xbf16, #tpu.memory_space<vmem>>, %arg4: memref<1x128xf32, #tpu.memory_space<vmem>>, %arg5: memref<128x128xbf16, #tpu.memory_space<vmem>>, %arg6: memref<1x128xf32, #tpu.memory_space<vmem>>, %arg7: memref<8x128xf32, #tpu.memory_space<vmem>>) attributes {dimension_semantics = [#tpu.dimension_semantics<parallel>], iteration_bounds = array<i64: 1>, scalar_prefetch = 0 : i64, scratch_operands = 0 : i64, tpu.core_type = #tpu.core_type<tc>, window_params = [{transform_indices = @transform_0, window_bounds = array<i64: 8, 1>}, {pipeline_mode = #tpu.pipeline_mode<synchronous>, transform_indices = @transform_1, window_bounds = array<i64: 2, 32>}, {pipeline_mode = #tpu.pipeline_mode<synchronous>, transform_indices = @transform_2, window_bounds = array<i64: 32, 128>}, {pipeline_mode = #tpu.pipeline_mode<synchronous>, transform_indices = @transform_3, window_bounds = array<i64: 1, 128>}, {pipeline_mode = #tpu.pipeline_mode<synchronous>, transform_indices = @transform_4, window_bounds = array<i64: 128, 128>}, {pipeline_mode = #tpu.pipeline_mode<synchronous>, transform_indices = @transform_5, window_bounds = array<i64: 1, 128>}, {transform_indices = @transform_6, window_bounds = array<i64: 8, 128>}]} {
    %c0 = arith.constant 0 : index
    %c0_0 = arith.constant 0 : index
    %0 = vector.load %arg1[%c0, %c0_0] : memref<8x1xf32, #tpu.memory_space<vmem>>, vector<8x1xf32>
    %c0_1 = arith.constant 0 : index
    %c0_2 = arith.constant 0 : index
    %1 = vector.load %arg2[%c0_1, %c0_2] : memref<2x32xf32, #tpu.memory_space<vmem>>, vector<2x32xf32>
    %2 = vector.extract_strided_slice %1 {offsets = [0, 0], sizes = [1, 32], strides = [1, 1]} : vector<2x32xf32> to vector<1x32xf32>
    %3 = vector.broadcast %0 : vector<8x1xf32> to vector<8x32xf32>
    %4 = vector.broadcast %2 : vector<1x32xf32> to vector<8x32xf32>
    %5 = arith.mulf %3, %4 : vector<8x32xf32>
    %6 = vector.extract_strided_slice %1 {offsets = [1, 0], sizes = [1, 32], strides = [1, 1]} : vector<2x32xf32> to vector<1x32xf32>
    %7 = vector.broadcast %6 : vector<1x32xf32> to vector<8x32xf32>
    %8 = arith.addf %5, %7 : vector<8x32xf32>
    %9 = math.sin %8 : vector<8x32xf32>
    %10 = arith.truncf %9 : vector<8x32xf32> to vector<8x32xbf16>
    %c0_3 = arith.constant 0 : index
    %c0_4 = arith.constant 0 : index
    %11 = vector.load %arg3[%c0_3, %c0_4] : memref<32x128xbf16, #tpu.memory_space<vmem>>, vector<32x128xbf16>
    %cst = arith.constant dense<0.000000e+00> : vector<8x128xf32>
    %12 = tpu.matmul %10, %11, %cst {dimension_numbers = #tpu.dot_dimension_numbers<[1], [0], [0], [1], [0, 0, 1, 1], [], []>} : vector<8x32xbf16>, vector<32x128xbf16>, vector<8x128xf32> -> vector<8x128xf32>
    %c0_5 = arith.constant 0 : index
    %c0_6 = arith.constant 0 : index
    %13 = vector.load %arg4[%c0_5, %c0_6] : memref<1x128xf32, #tpu.memory_space<vmem>>, vector<1x128xf32>
    %14 = vector.broadcast %13 : vector<1x128xf32> to vector<8x128xf32>
    %15 = arith.addf %12, %14 : vector<8x128xf32>
    %cst_7 = arith.constant 5.000000e-01 : f32
    %16 = vector.broadcast %cst_7 : f32 to vector<8x128xf32>
    %17 = arith.mulf %16, %15 : vector<8x128xf32>
    %18 = math.tanh %17 : vector<8x128xf32>
    %cst_8 = arith.constant 5.000000e-01 : f32
    %19 = vector.broadcast %cst_8 : f32 to vector<8x128xf32>
    %20 = arith.mulf %19, %18 : vector<8x128xf32>
    %cst_9 = arith.constant 5.000000e-01 : f32
    %21 = vector.broadcast %cst_9 : f32 to vector<8x128xf32>
    %22 = arith.addf %20, %21 : vector<8x128xf32>
    %23 = arith.mulf %15, %22 : vector<8x128xf32>
    %24 = arith.truncf %23 : vector<8x128xf32> to vector<8x128xbf16>
    %c0_10 = arith.constant 0 : index
    %c0_11 = arith.constant 0 : index
    %25 = vector.load %arg5[%c0_10, %c0_11] : memref<128x128xbf16, #tpu.memory_space<vmem>>, vector<128x128xbf16>
    %cst_12 = arith.constant dense<0.000000e+00> : vector<8x128xf32>
    %26 = tpu.matmul %24, %25, %cst_12 {dimension_numbers = #tpu.dot_dimension_numbers<[1], [0], [0], [1], [0, 0, 1, 1], [], []>} : vector<8x128xbf16>, vector<128x128xbf16>, vector<8x128xf32> -> vector<8x128xf32>
    %c0_13 = arith.constant 0 : index
    %c0_14 = arith.constant 0 : index
    %27 = vector.load %arg6[%c0_13, %c0_14] : memref<1x128xf32, #tpu.memory_space<vmem>>, vector<1x128xf32>
    %28 = vector.broadcast %27 : vector<1x128xf32> to vector<8x128xf32>
    %29 = arith.addf %26, %28 : vector<8x128xf32>
    %c0_15 = arith.constant 0 : index
    %c0_16 = arith.constant 0 : index
    %30 = vector.load %arg7[%c0_15, %c0_16] : memref<8x128xf32, #tpu.memory_space<vmem>>, vector<8x128xf32>
    tpu.vector_store %arg7[%c0_15, %c0_16], %29 {strides = array<i32>} : memref<8x128xf32, #tpu.memory_space<vmem>>, vector<8x128xf32>,
    return
  }
  func.func @transform_0(%arg0: i32) -> (i32, i32) {
    %c0_i32 = arith.constant 0 : i32
    %c0_i32_0 = arith.constant 0 : i32
    return %arg0, %c0_i32 : i32, i32
  }
  func.func @transform_1(%arg0: i32) -> (i32, i32) {
    %c0_i32 = arith.constant 0 : i32
    %c0_i32_0 = arith.constant 0 : i32
    %c0_i32_1 = arith.constant 0 : i32
    return %c0_i32, %c0_i32_0 : i32, i32
  }
  func.func @transform_2(%arg0: i32) -> (i32, i32) {
    %c0_i32 = arith.constant 0 : i32
    %c0_i32_0 = arith.constant 0 : i32
    %c0_i32_1 = arith.constant 0 : i32
    return %c0_i32, %c0_i32_0 : i32, i32
  }
  func.func @transform_3(%arg0: i32) -> (i32, i32) {
    %c0_i32 = arith.constant 0 : i32
    %c0_i32_0 = arith.constant 0 : i32
    %c0_i32_1 = arith.constant 0 : i32
    return %c0_i32, %c0_i32_0 : i32, i32
  }
  func.func @transform_4(%arg0: i32) -> (i32, i32) {
    %c0_i32 = arith.constant 0 : i32
    %c0_i32_0 = arith.constant 0 : i32
    %c0_i32_1 = arith.constant 0 : i32
    return %c0_i32, %c0_i32_0 : i32, i32
  }
  func.func @transform_5(%arg0: i32) -> (i32, i32) {
    %c0_i32 = arith.constant 0 : i32
    %c0_i32_0 = arith.constant 0 : i32
    %c0_i32_1 = arith.constant 0 : i32
    return %c0_i32, %c0_i32_0 : i32, i32
  }
  func.func @transform_6(%arg0: i32) -> (i32, i32) {
    %c0_i32 = arith.constant 0 : i32
    %c0_i32_0 = arith.constant 0 : i32
    return %arg0, %c0_i32 : i32, i32
  }
}

</mosaic_0001>

<bundles_post_ra>
// kernel: tpu_custom_call.1
= control target key start
LH: loop header
LB: loop body
LE: loop exit
PB: predicated region body
PF: predicated region fallthrough
CT: control target
= control target key end

     0   :  { %11 = vsyncpa [#allocation3], 0  ;;  %s678_s0 = inlined_call_operand.vmem [shape: f32[8,1], index: 0, kind: input, shape index: {}]   ;;  %s679_s1 = inlined_call_operand.hbm [shape: f32[2,32], index: 1, kind: input, shape index: {}]   ;;  %s680_s2 = inlined_call_operand.vmem [shape: bf16[32,128], index: 2, kind: input, shape index: {}]   ;;  %s681_s3 = inlined_call_operand.vmem [shape: f32[1,128], index: 3, kind: input, shape index: {}]   ;;  %s682_s4 = inlined_call_operand.hbm [shape: bf16[128,128], index: 4, kind: input, shape index: {}]   ;;  %s683_s5 = inlined_call_operand.vmem [shape: f32[1,128], index: 5, kind: input, shape index: {}]   ;;  %s684_s6 = inlined_call_operand.hbm [shape: f32[8,128], index: 6, kind: output, shape index: {}]  }
   0x1   :  { %12 = vsyncpa [#allocation6], 0 }
   0x2   :  { %13 = vsyncpa [#allocation4], 0  ;;  %s538_s21 = smov [#allocation2]   ;;  %s539_s23 = smov [#allocation5]  }
   0x3   :  { %s22_s22 = sshll.u32 %s538_s21, 4  ;;  %s35_s24 = sshll.u32 %s539_s23, 4  ;;  %s23_s22 = int_to_ptr.vmem [resolvable:$true] %s22_s22  ;;  %s587_s24 = int_to_ptr.vmem [resolvable:$true] %s35_s24 }
   0x4   :  { %s466_s27 = scalar_lea.hbm %s679_s1, 32 }
   0x5   :  { %p467_p0 = scmp.ne.s32.totalorder %s679_s1, %s466_s27  ;;  %p470_p1 = scmp.lt.u32.totalorder %s466_s27, %s679_s1 }
   0x7   :  { %p472_p2 = pnand %p470_p1, %p467_p0 }
   0x9   :  { %475 = shalt.err (!%p472_p2)
}
   0xa   :  { %s476_s8 = scalar_lea.vmem %s23_s22, 32  ;;  %p481_p4 = scmp.lt.s32.totalorder %s23_s22, %s23_s22 }
   0xb   :  { %p477_p3 = scmp.ne.s32.totalorder %s23_s22, %s476_s8  ;;  %p482_p5 = scmp.lt.s32.totalorder %s476_s8, %s476_s8 }
   0xd   :  { %p483_p6 = por %p482_p5, %p481_p4 }
   0xf   :  { %p484_p7 = pnand %p483_p6, %p477_p3 }
  0x11   :  { %487 = shalt.err (!%p484_p7)
}
  0x12   :  { %25 = dma.hbm_to_vmem [thread:$0]  %s679_s1, 32, %s23_s22, [#allocation3]  }
  0x13   :  { %s488_s13 = scalar_lea.hbm %s682_s4, 1024 }
  0x14   :  { %p489_p8 = scmp.ne.s32.totalorder %s682_s4, %s488_s13  ;;  %p492_p9 = scmp.lt.u32.totalorder %s488_s13, %s682_s4 }
  0x16   :  { %p494_p10 = pnand %p492_p9, %p489_p8 }
  0x18   :  { %497 = shalt.err (!%p494_p10)
}
  0x19   :  { %s498_s18 = scalar_lea.vmem %s587_s24, 1024  ;;  %p503_p12 = scmp.lt.s32.totalorder %s587_s24, %s587_s24 }
  0x1a   :  { %p499_p11 = scmp.ne.s32.totalorder %s587_s24, %s498_s18  ;;  %p504_p13 = scmp.lt.s32.totalorder %s498_s18, %s498_s18 }
  0x1c   :  { %p505_p0 = por %p504_p13, %p503_p12 }
  0x1e   :  { %p506_p1 = pnand %p505_p0, %p499_p11 }
  0x20   :  { %509 = shalt.err (!%p506_p1)
}
  0x21   :  { %s540_s1 = smov 64   ;;  %s541_s19 = smov 4  }
  0x22   :  { %41 = dma.hbm_to_vmem [thread:$0]  %s682_s4, 1024, %s587_s24, [#allocation6], %s540_s1, %s540_s1, %s541_s19  }
  0x23   :  { %532 = dma.done.wait [#allocation3], 32  }
  0x24   :  { %533 = vsyncadd [#allocation3], 4294967264 }
  0x25   :  { %534 = dma.done.wait [#allocation6], 1024  }
  0x26   :  { %535 = vsyncadd [#allocation6], 4294966272  ;;  %v542_v0 = vmov 0   ;;  %v51_v1 = vld [vmem:[%s678_s0] sm:$0xff]  ;;  %v543_v3 = vmov 0.0   ;;  %vm544_vm0 = vmmov 0   ;;  %v58_v7 = vlaneseq }
  0x27   :  { %449 = vset.pattern.permute.xlu0 %v542_v0  ;;  %v450_v2 = vld [vmem:[%s680_s2] sm:$0xff]   ;;  %403 = vmatprep.subr.bf16.mxu0 %v543_v3  ;;  %v451_v4 = vld [vmem:[%s680_s2 + $0x8] sm:$0xff]   ;;  %v545_v27 = vmov 683565275   ;;  %v546_v29 = vmov 2475754826  }
  0x28   :  { %55 = vperm.xlu0 %449, %v51_v1   ;;  %407 = vmatprep.mubr.msk.bf16.mxu0 %vm544_vm0, %v543_v3  ;;  %v452_v5 = vld [vmem:[#allocation5] sm:$0xff]   ;;  %v453_v6 = vld [vmem:[#allocation5 + $0x8] sm:$0xff]   ;;  %v59_v8 = vshrl.u32 %v58_v7, 7  ;;  %v52_v10 = vld [vmem:[#allocation2] sm:$0x3]  ;;  %vm196_vm14 = vcmask 261120  }
  0x29   :  { %404 = vmatpush3.bf16.msra.mxu0 %v450_v2  ;;  %411 = vmatprep.subr.bf16.mxu1 %v543_v3  ;;  %v547_v32 = vmov 2131351028   ;;  %v548_v35 = vmov 2102212464   ;;  %v549_v38 = vmov 920167782  }
  0x2a   :  { %405 = vmatprep.subr.bf16.mxu0 %v543_v3  ;;  %427 = vmatprep.mubr.msk.bf16.mxu1 %vm544_vm0, %v543_v3  ;;  %v60_v9 = vsub.s32 0, %v59_v8  ;;  %v65_v11 = vsub.s32 1, %v59_v8  ;;  %v550_v41 = vmov 1326507024   ;;  %s551_s29 = smov [#allocation7]  }
  0x2b   :  { %412 = vmatpush3.bf16.msra.mxu1 %v452_v5  ;;  %s364_s30 = sshll.u32 %s551_s29, 4  ;;  %s365_s30 = int_to_ptr.vmem [resolvable:$true] %s364_s30 }
  0x2c   :  { %413 = vmatprep.subr.bf16.mxu1 %v543_v3  ;;  %v61_v12 = vrot.slane %v52_v10, %v60_v9  ;;  %v66_v13 = vrot.slane %v52_v10, %v65_v11  ;;  %p515_p3 = scmp.lt.s32.totalorder %s365_s30, %s365_s30 }
  0x2d   :  { %406 = vmatpush3.bf16.msra.mxu0 %v451_v4 }
  0x2f   :  { %414 = vmatpush3.bf16.msra.mxu1 %v453_v6 }
  0x30   :  { %415 = vmatprep.subr.bf16.mxu1 %v543_v3 }
  0xa7   :  { %v56_v14 = vpop.permute.xlu0 %55 }
  0xa8   :  { %v62_v15 = vmul.f32 %v61_v12, %v56_v14 }
  0xaa   :  { %v634_v16 = vadd.f32 %v66_v13, %v62_v15 }
  0xac   :  { %v71_v17 = vand.u32 2139095040, %v634_v16  ;;  %v68_v21 = vand.u32 2147483647, %v634_v16  ;;  %vm70_vm8 = vcmp.lt.s32.totalorder %v634_v16, 0  ;;  %vm160_vm13 = vweird.f32 %v634_v16 }
  0xae   :  { %v72_v18 = vshrl.u32 %v71_v17, 23  ;;  %v75_v24 = vand.u32 8388607, %v68_v21  ;;  %vm69_vm9 = vcmp.le.f32.partialorder %v68_v21, 0.7853982 }
  0xb0   :  { %v374_v19 = vadd.s32 4294967169, %v72_v18  ;;  %v76_v43 = vor.u32 8388608, %v75_v24 }
  0xb2   :  { %v78_v20 = vadd.s32 1, %v374_v19  ;;  %v116_v57 = vshll.u32 %v76_v43, 8 }
  0xb4   :  { %vm79_vm1 = vcmp.gt.s32.totalorder %v78_v20, 0 }
  0xb5   :  { %v80_v22 = vsel %vm79_vm1, %v78_v20, 0 }
  0xb6   :  { %v82_v23 = vand.u32 31, %v80_v22  ;;  %v81_v26 = vshrl.u32 %v80_v22, 5 }
  0xb8   :  { %v83_v25 = vsub.s32 32, %v82_v23  ;;  %v85_v28 = vshll.u32 %v545_v27, %v82_v23  ;;  %v88_v30 = vshll.u32 %v546_v29, %v82_v23  ;;  %v91_v34 = vshll.u32 %v547_v32, %v82_v23 }
  0xb9   :  { %v94_v37 = vshll.u32 %v548_v35, %v82_v23  ;;  %v97_v40 = vshll.u32 %v549_v38, %v82_v23  ;;  %vm100_vm2 = vcmp.lt.s32.totalorder %v81_v26, 1  ;;  %vm103_vm3 = vcmp.lt.s32.totalorder %v81_v26, 4 }
  0xba   :  { %v86_v31 = vshrl.u32 %v546_v29, %v83_v25  ;;  %v89_v33 = vshrl.u32 %v547_v32, %v83_v25  ;;  %v92_v36 = vshrl.u32 %v548_v35, %v83_v25  ;;  %v95_v39 = vshrl.u32 %v549_v38, %v83_v25 }
  0xbb   :  { %v98_v42 = vshrl.u32 %v550_v41, %v83_v25  ;;  %v84_v52 = vshrl.u32 %v545_v27, %v83_v25  ;;  %vm102_vm4 = vcmp.lt.s32.totalorder %v81_v26, 3  ;;  %vm101_vm5 = vcmp.lt.s32.totalorder %v81_v26, 2 }
  0xbc   :  { %v87_v44 = vor.u32 %v86_v31, %v85_v28  ;;  %v90_v45 = vor.u32 %v89_v33, %v88_v30  ;;  %v93_v46 = vor.u32 %v92_v36, %v91_v34  ;;  %v96_v47 = vor.u32 %v95_v39, %v94_v37 }
  0xbd   :  { %v99_v48 = vor.u32 %v98_v42, %v97_v40 }
  0xbe   :  { %v105_v49 = vsel %vm103_vm3, %v93_v46, 2102212464  ;;  %v108_v50 = vsel %vm100_vm2, %v87_v44, %v90_v45  ;;  %v112_v51 = vsel %vm100_vm2, %v90_v45, %v93_v46  ;;  %v109_v53 = vsel %vm103_vm3, %v96_v47, 920167782 }
  0xbf   :  { %v113_v54 = vsel %vm103_vm3, %v99_v48, 1326507024  ;;  %v110_v55 = vsel %vm102_vm4, %v93_v46, %v109_v53  ;;  %v104_v58 = vsel %vm100_vm2, %v84_v52, %v87_v44  ;;  %v106_v59 = vsel %vm102_vm4, %v90_v45, %v105_v49  ;;  %v455_v48 = vld [vmem:[#allocation5 + $0x18] sm:$0xff]   ;;  %v456_v49 = vld [vmem:[#allocation5 + $0x20] sm:$0xff]  }
  0xc0   :  { %v114_v56 = vsel %vm102_vm4, %v96_v47, %v113_v54  ;;  %v111_v60 = vsel %vm101_vm5, %v108_v50, %v110_v55  ;;  %v107_v2 = vsel %vm101_vm5, %v104_v58, %v106_v59  ;;  %v454_v47 = vld [vmem:[#allocation5 + $0x10] sm:$0xff]   ;;  %v457_v50 = vld [vmem:[#allocation5 + $0x28] sm:$0xff]   ;;  %v378_v52 = vld [vmem:[%s681_s3] ss:$0 sm:$0xff]  ;;  %s510_s3 = scalar_lea.vmem %s365_s30, 128 }
  0xc1   :  { %v115_v61 = vsel %vm101_vm5, %v112_v51, %v114_v56  ;;  %v643_v0 = vmul.u32.u64.low %v116_v57, %v111_v60  ;;  %v644_v1 = vmul.u32.u64.high %v116_v57, %v111_v60, %v643_v0  ;;  %v123_v5 = vmul.u32 %v116_v57, %v107_v2  ;;  %416 = vmatpush3.bf16.msra.mxu1 %v454_v47  ;;  %v459_v51 = vld [vmem:[#allocation5 + $0x38] sm:$0xff]   ;;  %p511_p2 = scmp.ne.s32.totalorder %s365_s30, %s510_s3  ;;  %p516_p4 = scmp.lt.s32.totalorder %s510_s3, %s510_s3 }
  0xc2   :  { %v640_v62 = vmul.u32.u64.low %v116_v57, %v115_v61  ;;  %v641_v63 = vmul.u32.u64.high %v116_v57, %v115_v61, %v640_v62  ;;  %417 = vmatprep.subr.bf16.mxu1 %v543_v3 }
  0xc3   :  { %v126_v4 = vadd.s32 1, %v644_v1  ;;  %p517_p5 = por %p516_p4, %p515_p3 }
  0xc4   :  { %vm125_vm6 = vc.u32 %v641_v63, %v643_v0  ;;  %v124_v18 = vadd.s32 %v643_v0, %v641_v63 }
  0xc5   :  { %v127_v6 = vsel %vm125_vm6, %v126_v4, %v644_v1  ;;  %418 = vmatpush3.bf16.msra.mxu1 %v455_v48  ;;  %p518_p6 = pnand %p517_p5, %p511_p2 }
  0xc6   :  { %v128_v7 = vadd.s32 %v127_v6, %v123_v5  ;;  %419 = vmatprep.subr.bf16.mxu1 %v543_v3 }
  0xc8   :  { %v129_v8 = vadd.s32 536870912, %v128_v7 }
  0xc9   :  { %420 = vmatpush3.bf16.msra.mxu1 %v456_v49 }
  0xca   :  { %v130_v9 = vshrl.u32 %v129_v8, 30  ;;  %421 = vmatprep.subr.bf16.mxu1 %v543_v3 }
  0xcc   :  { %v131_v10 = vshll.u32 %v130_v9, 30  ;;  %v154_v31 = vsub.s32 4, %v130_v9 }
  0xcd   :  { %422 = vmatpush3.bf16.msra.mxu1 %v457_v50 }
  0xce   :  { %v132_v11 = vsub.s32 %v128_v7, %v131_v10  ;;  %v155_v34 = vsel %vm70_vm8, %v154_v31, %v130_v9  ;;  %423 = vmatprep.subr.bf16.mxu1 %v543_v3 }
  0xcf   :  { %v157_v36 = vsel %vm69_vm9, 0, %v155_v34 }
  0xd0   :  { %v134_v12 = vsub.s32 0, %v132_v11  ;;  %v161_v37 = vadd.s32 3, %v157_v36 }
  0xd2   :  { %v375_v13 = vmin.u32 %v134_v12, %v132_v11  ;;  %v162_v38 = vand.u32 3, %v161_v37 }
  0xd4   :  { %v136_v14 = vclz %v375_v13  ;;  %vm167_vm10 = vcmp.eq.s32.totalorder %v162_v38, 2  ;;  %vm164_vm11 = vcmp.eq.s32.totalorder %v162_v38, 0  ;;  %vm163_vm12 = vcmp.lt.s32.totalorder %v162_v38, 2 }
  0xd6   :  { %v376_v15 = vadd.s32 4294967294, %v136_v14 }
  0xd8   :  { %vm377_vm7 = vcmp.lt.s32.totalorder %v376_v15, 0 }
  0xd9   :  { %v139_v17 = vsel %vm377_vm7, 0, %v376_v15 }
  0xda   :  { %v140_v19 = vsub.s32 32, %v139_v17  ;;  %v144_v20 = vsub.s32 4294967266, %v139_v17  ;;  %v141_v22 = vshll.u32 %v132_v11, %v139_v17 }
  0xdc   :  { %v142_v23 = vshrl.u32 %v124_v18, %v140_v19  ;;  %v145_v24 = vadd.s32 127, %v144_v20 }
  0xde   :  { %v143_v25 = vor.u32 %v142_v23, %v141_v22  ;;  %v146_v26 = vshll.u32 %v145_v24, 23 }
  0xe0   :  { %v147_v27 = vor.u32 4788187, %v146_v26  ;;  %v150_v29 = vcvt.s32.f32 %v143_v25 }
  0xe2   :  { %v148_v28 = vand.u32 2147483647, %v147_v27 }
  0xe4   :  { %v151_v30 = vmul.f32 %v150_v29, %v148_v28 }
  0xe6   :  { %v152_v32 = vxor.u32 2147483648, %v151_v30 }
  0xe8   :  { %v153_v33 = vsel %vm70_vm8, %v152_v32, %v151_v30 }
  0xe9   :  { %v156_v35 = vsel %vm69_vm9, %v634_v16, %v153_v33  ;;  %v458_v16 = vld [vmem:[#allocation5 + $0x30] sm:$0xff]  }
  0xea   :  { %460 = vcosq.f32 %v156_v35  ;;  %424 = vmatpush3.bf16.msra.mxu1 %v458_v16 }
  0xeb   :  { %462 = vsinq.f32 %v156_v35  ;;  %425 = vmatprep.subr.bf16.mxu1 %v543_v3  ;;  %v382_v3 = vld [vmem:[%s683_s5] ss:$0 sm:$0xff] }
  0xee   :  { %426 = vmatpush3.bf16.msra.mxu1 %v459_v51 }
  0xf4   :  { %v461_v39 = vpop.eup %460 }
  0xf5   :  { %v463_v40 = vpop.eup %462  ;;  %v168_v41 = vxor.u32 2147483648, %v461_v39 }
  0xf6   :  { %v165_v42 = vxor.u32 2147483648, %v463_v40 }
  0xf7   :  { %v169_v43 = vsel %vm167_vm10, %v168_v41, %v463_v40 }
  0xf8   :  { %v166_v44 = vsel %vm164_vm11, %v461_v39, %v165_v42 }
  0xf9   :  { %v170_v21 = vsel %vm163_vm12, %v166_v44, %v169_v43 }
  0xfa   :  { %v171_v45 = vsel %vm160_vm13, nan, %v170_v21 }
  0xfb   :  { %v172_v46 = vpack.c.bf16 %v171_v45, %v171_v45 }
  0xfd   :  { %408 = vmatmul.mubr.msk.bf16.vlgmr.msra.gmra.mrb[0].mxu0 %vm196_vm14, %v172_v46 }
 0x1d0   :  { %v234_v53 = vpop.f32.mrb[0].mxu0 }
 0x1d1   :  { %v235_v54 = vadd.f32 %v378_v52, %v234_v53  ;;  %v409_v55 = vpop.f32.mrb[1].mxu0 }
 0x1d2   :  { %v237_v56 = vpop.f32.mrb[2].mxu0 }
 0x1d3   :  { %v240_v57 = vmul.f32 0.5, %v235_v54  ;;  %v410_v58 = vpop.f32.mrb[3].mxu0 }
 0x1d5   :  { %464 = vtanh.f32 %v240_v57 }
 0x1df   :  { %v465_v59 = vpop.eup %464 }
 0x1e0   :  { %v242_v60 = vmul.f32 0.5, %v465_v59 }
 0x1e2   :  { %v243_v61 = vadd.f32 0.5, %v242_v60 }
 0x1e4   :  { %v244_v62 = vmul.f32 %v243_v61, %v235_v54 }
 0x1e6   :  { %v245_v63 = vpack.c.bf16 %v244_v62, %v244_v62 }
 0x1e8   :  { %428 = vmatmul.mubr.bf16.vlgmr.msra.gmra.mrb[0].mxu1 %v245_v63 }
 0x2bb   :  { %v351_v0 = vpop.f32.mrb[0].mxu1 }
 0x2bc   :  { %v352_v1 = vadd.f32 %v382_v3, %v351_v0  ;;  %v429_v2 = vpop.f32.mrb[1].mxu1 }
 0x2bd   :  { %v354_v4 = vpop.f32.mrb[2].mxu1 }
 0x2be   :  { %357 = vst [vmem:[#allocation7] sm:$0xff] %v352_v1  ;;  %v430_v5 = vpop.f32.mrb[3].mxu1 }
 0x2bf   :  { %521 = shalt.err (!%p518_p6)
}
 0x2c0   :  { %s522_s5 = scalar_lea.hbm %s684_s6, 128 }
 0x2c1   :  { %p523_p7 = scmp.ne.s32.totalorder %s684_s6, %s522_s5  ;;  %p526_p8 = scmp.lt.u32.totalorder %s522_s5, %s684_s6 }
 0x2c3   :  { %p528_p9 = pnand %p526_p8, %p523_p7 }
 0x2c5   :  { %531 = shalt.err (!%p528_p9)
}
 0x2c6   :  { %367 = dma.vmem_to_hbm [thread:$0]  %s365_s30, 128, %s684_s6, [#allocation4]  }
 0x2c7   :  { %536 = dma.done.wait [#allocation4], 128  }
 0x2c8   :  { %537 = vsyncadd [#allocation4], 4294967168 }
 0x2c9   :  { %371 = vsyncpa [#allocation3], 1 }
 0x2ca   :  { %372 = vsyncpa [#allocation6], 1 }
 0x2cb   :  { %373 = vsyncpa [#allocation4], 1 }

</bundles_post_ra>
